<compile_context>
chip_gen: v7x
topology: tpu7x:2x2x1
jax: 0.10.0
libtpu: 0.0.40
codegen_flags: <defaults>
</compile_context>

<pallas_src>
import functools

import jax
import jax.numpy as jnp
from jax.experimental import pallas as pl
from jax.experimental.pallas import tpu as pltpu

EPS = 1e-5
_MIB = 1024 * 1024

_MAX_TILE_ROWS = 16384            # tile-size sweep plateaus far below this
_VMEM_HEADROOM_BYTES = 8 * _MIB   # internal scratch / accounting slack


def _round_up(x, m):
    return ((x + m - 1) // m) * m


def _device_kind():
    try:
        return jax.devices()[0].device_kind.lower()
    except Exception:
        return ""


def _physical_vmem_bytes():
    """Best-effort physical VMEM per TensorCore (v5e/v6e: 128 MiB, v7x: 64 MiB)."""
    phys = None
    try:
        phys = int(pltpu.get_tpu_info().vmem_capacity_bytes)
    except Exception:
        phys = None
    kind = _device_kind()
    if phys is None or phys <= 0:
        if "v7" in kind:
            phys = 64 * _MIB
        elif any(t in kind for t in ("lite", "v5e", "v6e", "v5", "v6", "v4")):
            phys = 128 * _MIB
        else:
            phys = 64 * _MIB          # conservative (v7x-sized) fallback
    if "v7" in kind:
        phys = min(phys, 64 * _MIB)   # 64 MiB per TensorCore on v7x
    return phys


def _single_tensorcore_chip():
    """v5e / v6e have a single TensorCore; everything else is treated as multi-TC."""
    kind = _device_kind()
    return ("lite" in kind) or ("v5e" in kind) or ("v6e" in kind)


def _rel_proj_kernel(x_ref, w_ref, b_ref, o_ref, *, num_features):
    # x_ref: (tile_rows, in_size)      w_ref: (in_size, nf_pad)   [resident]
    # b_ref: (1, nf_pad)               o_ref: (tile_rows, nf_pad)
    y = jnp.dot(x_ref[...], w_ref[...], preferred_element_type=jnp.float32)
    y = y + b_ref[...].astype(jnp.float32)

    nf_pad = y.shape[-1]
    inv_nf = 1.0 / num_features
    # Padded feature columns (if any) are exactly 0 (zero weight cols, zero bias),
    # so the plain sum gives the true mean when scaled by 1/num_features.
    mean = jnp.sum(y, axis=-1, keepdims=True) * inv_nf
    d = y - mean
    if nf_pad != num_features:  # static: mask padded columns out of the variance
        col = jax.lax.broadcasted_iota(jnp.int32, y.shape, y.ndim - 1)
        d = jnp.where(col < num_features, d, 0.0)
    # Two-pass (centered) biased variance -- matches PyTorch InstanceNorm numerics.
    var = jnp.sum(d * d, axis=-1, keepdims=True) * inv_nf
    o_ref[...] = (d * jax.lax.rsqrt(var + EPS)).astype(o_ref.dtype)


def _choose_tile_rows(rows, in_size, nf_pad, itemsize, vmem_limit, min_grid_steps):
    """Largest row tile (multiple of 8, <= _MAX_TILE_ROWS) fitting the VMEM limit."""
    # Per row of tile: double-buffered x block + double-buffered out block
    # + ~4 live f32 copies of the (tile_rows, nf_pad) intermediates (y, y-mean, ...).
    per_row = (2 * in_size * itemsize
               + 2 * nf_pad * itemsize
               + 4 * nf_pad * 4)
    # Weight + bias, conservatively counted double-buffered at f32 width.
    weight_bytes = 2 * (in_size + 1) * nf_pad * 4
    budget = max(vmem_limit - weight_bytes - _VMEM_HEADROOM_BYTES, 8 * per_row)
    t = min(_MAX_TILE_ROWS, budget // per_row)
    t = max(8, (int(t) // 8) * 8)
    t = min(t, _round_up(rows, 8))
    if min_grid_steps > 1 and rows >= 16:
        # Keep >= min_grid_steps grid steps so v7x's two TensorCores both get work.
        t = min(t, _round_up(pl.cdiv(rows, min_grid_steps), 8))
    return int(max(8, t))


@functools.partial(jax.jit, static_argnames=("tile_rows",))
def relational_projection(x, weight, bias, *, tile_rows=None):
    """x: (N, S, in_size); weight: (in_size, num_features); bias: (num_features,).

    weight is stored transposed relative to PyTorch so the matmul is x @ W + b.
    """
    n, s, in_size = x.shape
    num_features = weight.shape[1]
    rows = n * s

    # Lane-dense output: pad the feature axis to a multiple of 128 so stores are
    # full-width (unmasked).  Padded columns are zero and sliced off below.
    nf_pad = max(128, _round_up(num_features, 128))
    if nf_pad != num_features:
        weight = jnp.pad(weight, ((0, 0), (0, nf_pad - num_features)))
        bias = jnp.pad(bias, ((0, nf_pad - num_features),))

    # Generation-aware VMEM limit: 3/4 of physical, capped at 96 MiB.
    #   v5e/v6e -> 96 MiB, v7x -> 48 MiB (64 MiB per TensorCore physical).
    vmem_limit = int(max(32 * _MIB, min((_physical_vmem_bytes() * 3) // 4, 96 * _MIB)))
    min_grid_steps = 1 if _single_tensorcore_chip() else 2

    if tile_rows is None:
        tile_rows = _choose_tile_rows(
            rows, in_size, nf_pad, jnp.dtype(x.dtype).itemsize,
            vmem_limit, min_grid_steps)

    grid = pl.cdiv(rows, tile_rows)   # ragged last block handled by Pallas

    x2d = x.reshape(rows, in_size)
    b2d = bias.reshape(1, nf_pad)

    out2d = pl.pallas_call(
        functools.partial(_rel_proj_kernel, num_features=num_features),
        out_shape=jax.ShapeDtypeStruct((rows, nf_pad), x.dtype),
        grid_spec=pltpu.PrefetchScalarGridSpec(
            num_scalar_prefetch=0,
            grid=(grid,),
            in_specs=[
                pl.BlockSpec((tile_rows, in_size), lambda i: (i, 0)),
                # Weight/bias have constant index maps -> resident across the grid.
                pl.BlockSpec((in_size, nf_pad), lambda i: (0, 0)),
                pl.BlockSpec((1, nf_pad), lambda i: (0, 0)),
            ],
            out_specs=pl.BlockSpec((tile_rows, nf_pad), lambda i: (i, 0)),
        ),
        compiler_params=pltpu.CompilerParams(
            # Row axis is independent -> megacore-shardable on multi-TC chips.
            dimension_semantics=("parallel",),
            vmem_limit_bytes=vmem_limit,
        ),
    )(x2d, weight, b2d)

    if nf_pad != num_features:
        out2d = out2d[:, :num_features]
    return out2d.reshape(n, s, num_features)


def _reference(x, weight, bias):
    y = jnp.einsum("nsi,if->nsf", x, weight) + bias
    mean = jnp.mean(y, axis=-1, keepdims=True)
    var = jnp.mean((y - mean) ** 2, axis=-1, keepdims=True)
    return (y - mean) / jnp.sqrt(var + EPS)


if __name__ == "__main__":
    # Small shapes implied by the forward: x is (batch, num_entities, in_size).
    batch, seq, in_size, num_features = 2, 8, 32, 128

    key = jax.random.PRNGKey(0)
    kx, kw, kb, kx2, kw2, kb2 = jax.random.split(key, 6)

    x = jax.random.normal(kx, (batch, seq, in_size), dtype=jnp.float32)

    # Deterministic param init mimicking nn.Linear default: U(-1/sqrt(in), 1/sqrt(in)).
    bound = 1.0 / (in_size ** 0.5)
    # weight stored transposed relative to PyTorch: (in_size, num_features)
    weight = jax.random.uniform(kw, (in_size, num_features), jnp.float32, -bound, bound)
    bias = jax.random.uniform(kb, (num_features,), jnp.float32, -bound, bound)

    out = jax.block_until_ready(relational_projection(x, weight, bias))
    ref = _reference(x, weight, bias)
    assert out.shape == (batch, seq, num_features)
    assert jnp.allclose(out, ref, atol=1e-4, rtol=1e-4), "mismatch vs reference"

    # Ragged row grid (rows % tile_rows != 0) -- no wrapper-side padding pass.
    x_odd = jax.random.normal(kx2, (3, 7, in_size), dtype=jnp.float32)
    out_odd = jax.block_until_ready(
        relational_projection(x_odd, weight, bias, tile_rows=8))
    ref_odd = _reference(x_odd, weight, bias)
    assert jnp.allclose(out_odd, ref_odd, atol=1e-4, rtol=1e-4), "mismatch (ragged path)"

    # Non-multiple-of-128 feature width -> lane-padded weight/bias path.
    nf2 = 96
    w2 = jax.random.uniform(kw2, (in_size, nf2), jnp.float32, -bound, bound)
    b2 = jax.random.uniform(kb2, (nf2,), jnp.float32, -bound, bound)
    out2 = jax.block_until_ready(relational_projection(x, w2, b2))
    ref2 = _reference(x, w2, b2)
    assert out2.shape == (batch, seq, nf2)
    assert jnp.allclose(out2, ref2, atol=1e-4, rtol=1e-4), "mismatch (lane-pad path)"

    print("KERNEL_OK")
</pallas_src>

<mosaic_0001>
module attributes {stable_mosaic.version = 11 : i64} {
  func.func @_rel_proj_kernel(%arg0: i32, %arg1: memref<8x32xf32, #tpu.memory_space<vmem>>, %arg2: memref<32x128xf32, #tpu.memory_space<vmem>>, %arg3: memref<1x128xf32, #tpu.memory_space<vmem>>, %arg4: memref<8x128xf32, #tpu.memory_space<vmem>>) attributes {dimension_semantics = [#tpu.dimension_semantics<parallel>], iteration_bounds = array<i64: 2>, scalar_prefetch = 0 : i64, scratch_operands = 0 : i64, tpu.core_type = #tpu.core_type<tc>, window_params = [{transform_indices = @transform_0, window_bounds = array<i64: 8, 32>}, {pipeline_mode = #tpu.pipeline_mode<synchronous>, transform_indices = @transform_1, window_bounds = array<i64: 32, 128>}, {pipeline_mode = #tpu.pipeline_mode<synchronous>, transform_indices = @transform_2, window_bounds = array<i64: 1, 128>}, {transform_indices = @transform_3, window_bounds = array<i64: 8, 128>}]} {
    %c0 = arith.constant 0 : index
    %c0_0 = arith.constant 0 : index
    %0 = vector.load %arg1[%c0, %c0_0] : memref<8x32xf32, #tpu.memory_space<vmem>>, vector<8x32xf32>
    %c0_1 = arith.constant 0 : index
    %c0_2 = arith.constant 0 : index
    %1 = vector.load %arg2[%c0_1, %c0_2] : memref<32x128xf32, #tpu.memory_space<vmem>>, vector<32x128xf32>
    %cst = arith.constant dense<0.000000e+00> : vector<8x128xf32>
    %2 = tpu.matmul %0, %1, %cst {dimension_numbers = #tpu.dot_dimension_numbers<[1], [0], [0], [1], [0, 0, 1, 1], [], []>} : vector<8x32xf32>, vector<32x128xf32>, vector<8x128xf32> -> vector<8x128xf32>
    %c0_3 = arith.constant 0 : index
    %c0_4 = arith.constant 0 : index
    %3 = vector.load %arg3[%c0_3, %c0_4] : memref<1x128xf32, #tpu.memory_space<vmem>>, vector<1x128xf32>
    %4 = vector.broadcast %3 : vector<1x128xf32> to vector<8x128xf32>
    %5 = arith.addf %2, %4 : vector<8x128xf32>
    %cst_5 = arith.constant dense<0.000000e+00> : vector<8xf32>
    %6 = vector.multi_reduction <add>, %5, %cst_5 [1] : vector<8x128xf32> to vector<8xf32>
    %7 = vector.shape_cast %6 : vector<8xf32> to vector<8x1xf32>
    %cst_6 = arith.constant 7.812500e-03 : f32
    %8 = vector.broadcast %cst_6 : f32 to vector<8x1xf32>
    %9 = arith.mulf %7, %8 : vector<8x1xf32>
    %10 = vector.broadcast %9 : vector<8x1xf32> to vector<8x128xf32>
    %11 = arith.subf %5, %10 : vector<8x128xf32>
    %12 = arith.mulf %11, %11 : vector<8x128xf32>
    %cst_7 = arith.constant dense<0.000000e+00> : vector<8xf32>
    %13 = vector.multi_reduction <add>, %12, %cst_7 [1] : vector<8x128xf32> to vector<8xf32>
    %14 = vector.shape_cast %13 : vector<8xf32> to vector<8x1xf32>
    %cst_8 = arith.constant 7.812500e-03 : f32
    %15 = vector.broadcast %cst_8 : f32 to vector<8x1xf32>
    %16 = arith.mulf %14, %15 : vector<8x1xf32>
    %cst_9 = arith.constant 9.99999974E-6 : f32
    %17 = vector.broadcast %cst_9 : f32 to vector<8x1xf32>
    %18 = arith.addf %16, %17 : vector<8x1xf32>
    %19 = math.rsqrt %18 : vector<8x1xf32>
    %20 = vector.broadcast %19 : vector<8x1xf32> to vector<8x128xf32>
    %21 = arith.mulf %11, %20 : vector<8x128xf32>
    %c0_10 = arith.constant 0 : index
    %c0_11 = arith.constant 0 : index
    %22 = vector.load %arg4[%c0_10, %c0_11] : memref<8x128xf32, #tpu.memory_space<vmem>>, vector<8x128xf32>
    tpu.vector_store %arg4[%c0_10, %c0_11], %21 {strides = array<i32>} : memref<8x128xf32, #tpu.memory_space<vmem>>, vector<8x128xf32>,
    return
  }
  func.func @transform_0(%arg0: i32) -> (i32, i32) {
    %c0_i32 = arith.constant 0 : i32
    %c0_i32_0 = arith.constant 0 : i32
    return %arg0, %c0_i32 : i32, i32
  }
  func.func @transform_1(%arg0: i32) -> (i32, i32) {
    %c0_i32 = arith.constant 0 : i32
    %c0_i32_0 = arith.constant 0 : i32
    %c0_i32_1 = arith.constant 0 : i32
    return %c0_i32, %c0_i32_0 : i32, i32
  }
  func.func @transform_2(%arg0: i32) -> (i32, i32) {
    %c0_i32 = arith.constant 0 : i32
    %c0_i32_0 = arith.constant 0 : i32
    %c0_i32_1 = arith.constant 0 : i32
    return %c0_i32, %c0_i32_0 : i32, i32
  }
  func.func @transform_3(%arg0: i32) -> (i32, i32) {
    %c0_i32 = arith.constant 0 : i32
    %c0_i32_0 = arith.constant 0 : i32
    return %arg0, %c0_i32 : i32, i32
  }
}

</mosaic_0001>

<bundles_post_ra>
// kernel: relational_projection.1
= control target key start
LH: loop header
LB: loop body
LE: loop exit
PB: predicated region body
PF: predicated region fallthrough
CT: control target
= control target key end

     0   :  { %8 = vsyncpa [#allocation3], 0  ;;  %s856_s0 = inlined_call_operand.hbm [shape: f32[16,32], index: 0, kind: input, shape index: {}]   ;;  %s857_s1 = inlined_call_operand.hbm [shape: f32[32,128], index: 1, kind: input, shape index: {}]   ;;  %s858_s2 = inlined_call_operand.vmem [shape: f32[1,128], index: 2, kind: input, shape index: {}]   ;;  %s859_s3 = inlined_call_operand.hbm [shape: f32[16,128], index: 3, kind: output, shape index: {}]  }
   0x1   :  { %10 = vsyncpa [#allocation3 + $0x1], 0 }
   0x2   :  { %11 = vsyncpa [#allocation6], 0 }
   0x3   :  { %12 = vsyncpa [#allocation4], 0 }
   0x4   :  { %14 = vsyncpa [#allocation4 + $0x1], 0  ;;  %s653_s12 = smov 0   ;;  %s655_s13 = smov 0  }
   0x5   :  { %s657_s14 = smov 0   ;;  %s659_s15 = smov 0  }
   0x6 LB: > { %s674_s16 = sadd.s32 4294967295, %s623_s15   ;;  %s393_s17 = sadd.s32 4294967294, %s623_s15   ;;  %s623_s15 = sphi %s659_s15, %s879_s15   ;;  %s619_s14 = sphi %s657_s14, %s878_s14   ;;  %s615_s13 = sphi %s655_s13, %s877_s13   ;;  %s611_s12 = sphi %s653_s12, %s876_s12  }
   0x7   : > { %p40_p0 = scmp.ne.s32.totalorder %s615_s13, %s611_s12  ;;  %p860_p1 = scmp.eq.s32.totalorder %s674_s16, 0 }
   0x8   : > { %p112_p3 = scmp.eq.s32.totalorder %s393_s17, 1  ;;  %p394_p5 = scmp.ge.s32.totalorder %s623_s15, 1 }
   0x9   : > { %p683_p4 = por %p860_p1, %p40_p0  ;;  %p119_p7 = scmp.lt.s32.totalorder %s623_s15, 3 }
   0xa   : > { %p688_p6 = por %p112_p3, %p40_p0  ;;  %s625_s21 = smov [#allocation5]  }
   0xb   : > { %s863_s18 = scalar_select %p683_p4, 1, 0 }
   0xc   : > { %s864_s19 = scalar_select %p688_p6, 1, 0 }
   0xd   : > { %p693_p8 = pnand %p394_p5, %p119_p7  ;;  %s131_s22 = sshll.u32 %s625_s21, 4  ;;  %s697_s22 = int_to_ptr.vmem [resolvable:$true] %s131_s22 }
   0xe   : > { %s709_s24 = sadd.s32 1, %s623_s15   ;;  %s27_s25 = sadd.s32 1, %s619_s14 }
   0xf   : > { %s865_s20 = scalar_select %p693_p8, 1, 0 }
  0x10   : > { %p439_p9 = pneg %p693_p8  ;;  %s24_s26 = ssub.s32 %s623_s15, %s709_s24 }
  0x11   : > { %s495_s29 = scalar_lea.hbm %s857_s1, 512 }
  0x12   : > { %p704_p11 = pnand %p439_p9, %p860_p1  ;;  %p496_p12 = scmp.ne.s32.totalorder %s857_s1, %s495_s29 }
  0x13   : > { %p502_p5 = scmp.lt.u32.totalorder %s495_s29, %s857_s1 }
  0x14   : > { %p497_p13 = pneg %p704_p11 }
  0x16   : > { %p498_p0 = pnand %p497_p13, %p496_p12 }
  0x18   : > { %p499_p3 = pneg %p498_p0 }
  0x1a   : > { %p504_p7 = pnand %p502_p5, %p499_p3 }
  0x1c   : > { %507 = shalt.err (!%p504_p7)
}
  0x1d   : > { %s508_s7 = scalar_lea.vmem %s697_s22, 512  ;;  %p516_p2 = scmp.lt.s32.totalorder %s697_s22, %s697_s22 }
  0x1e   : > { %p509_p9 = scmp.ne.s32.totalorder %s697_s22, %s508_s7  ;;  %p517_p6 = scmp.lt.s32.totalorder %s508_s7, %s508_s7 }
  0x20   : > { %p511_p10 = pnand %p509_p9, %p497_p13  ;;  %p518_p4 = por %p517_p6, %p516_p2 }
  0x22   : > { %p512_p1 = pneg %p511_p10 }
  0x24   : > { %p519_p8 = pnand %p518_p4, %p512_p1 }
  0x26   : > { %522 = shalt.err (!%p519_p8)
}
  0x27   : > { %s626_s8 = smov 128   ;;  %s627_s9 = smov 8  }
  0x28   : > { %442 = dma.hbm_to_vmem [thread:$0]  (!%p704_p11), %s857_s1, 512, %s697_s22, [#allocation6], %s626_s8, %s626_s8, %s627_s9  }
  0x29   : > { %p25_p2 = scmp.eq.s32.totalorder %s24_s26, 0  ;;  %p34_p1 = scmp.ne.s32.totalorder %s619_s14, %s615_s13 }
  0x2a   : > { %p35_p4 = scmp.eq.s32.totalorder %s623_s15, 0  ;;  %p452_p6 = scmp.lt.s32.totalorder %s623_s15, 2 }
  0x2b   : > { %s740_s17 = scalar_select %p25_p2, %s619_s14, %s27_s25  }
  0x2c   : > { %p36_p8 = por %p35_p4, %p34_p1  ;;  %p867_p10 = scmp.eq.s32.totalorder %s674_s16, 1 }
  0x2d   : > { %s148_s27 = sand.u32 1, %s619_s14   ;;  %s398_s28 = sshll.u32 %s623_s15, 7 }
  0x2e   : > { %p744_p12 = por %p867_p10, %p34_p1  ;;  %s397_s29 = sshll.u32 %s148_s27, 3 }
  0x2f   : > { %s753_s4 = scalar_lea.hbm %s856_s0, %s398_s28  ;;  %s152_s22 = scalar_lea.vmem [#allocation2], %s397_s29 }
  0x30   : > { %s159_s25 = sshll.u32 %s152_s22, 4  ;;  %p755_p11 = pnand %p452_p6, %p36_p8  ;;  %s759_s25 = int_to_ptr.vmem [resolvable:$true] %s159_s25 }
  0x31   : > { %s149_s5 = scalar_lea.sflag [#allocation3], %s148_s27  ;;  %s523_s6 = scalar_lea.hbm %s753_s4, 128 }
  0x32   : > { %p524_p13 = scmp.ne.s32.totalorder %s753_s4, %s523_s6  ;;  %p525_p0 = pneg %p755_p11 }
  0x33   : > { %s528_s9 = scalar_lea.hbm %s856_s0, 256  ;;  %p529_p7 = scmp.lt.u32.totalorder %s753_s4, %s856_s0 }
  0x34   : > { %p526_p3 = pnand %p525_p0, %p524_p13  ;;  %p530_p9 = scmp.lt.u32.totalorder %s528_s9, %s523_s6 }
  0x35   : > { %p532_p1 = scmp.lt.u32.totalorder %s523_s6, %s753_s4 }
  0x36   : > { %p527_p5 = pneg %p526_p3  ;;  %p531_p2 = por %p530_p9, %p529_p7 }
  0x38   : > { %p533_p4 = por %p532_p1, %p531_p2 }
  0x3a   : > { %p534_p6 = pnand %p533_p4, %p527_p5 }
  0x3c   : > { %537 = shalt.err (!%p534_p6)
}
  0x3d   : > { %s538_s27 = scalar_lea.vmem %s759_s25, 128  ;;  %s628_s28 = smov [#allocation2]  }
  0x3e   : > { %p539_p8 = scmp.ne.s32.totalorder %s759_s25, %s538_s27  ;;  %s543_s29 = sshll.u32 %s628_s28, 4  ;;  %s544_s29 = int_to_ptr.vmem [resolvable:$false] %s543_s29 }
  0x3f   : > { %s545_s23 = scalar_lea.vmem %s544_s29, 256  ;;  %p546_p3 = scmp.lt.s32.totalorder %s759_s25, %s544_s29 }
  0x40   : > { %p541_p10 = pnand %p539_p8, %p525_p0  ;;  %p547_p7 = scmp.lt.s32.totalorder %s545_s23, %s538_s27 }
  0x42   : > { %p542_p13 = pneg %p541_p10  ;;  %p548_p9 = por %p547_p7, %p546_p3 }
  0x44   : > { %p549_p2 = pnand %p548_p9, %p542_p13 }
  0x46   : > { %552 = shalt.err (!%p549_p2)
}
  0x47   : > { %446 = dma.hbm_to_vmem [thread:$0]  (!%p755_p11), %s753_s4, 128, %s759_s25, %s149_s5  }
  0x48   : > { %p870_p5 = scmp.ne.s32.totalorder %s865_s20, 0 }
  0x49   : > { %s789_s30 = sand.u32 (!%p870_p5), 1, %s615_s13   ;;  %p871_p0 = scmp.ne.s32.totalorder (!%p870_p5), %s863_s18, 0 }
  0x4a   : > { %168 = sbr.rel (%p870_p5) target bundleno = 630 (0x276), region = 32  ;;  %s400_s22 = sshll.u32 (!%p870_p5), %s789_s30, 3 }
  0x4b   : > { %s171_s6 = scalar_lea.sflag (!%p870_p5), [#allocation3], %s789_s30  ;;  %s174_s7 = scalar_lea.vmem (!%p870_p5), [#allocation2], %s400_s22 }
  0x51   : > { %598 = dma.done.wait (%p871_p0), %s171_s6, 128  }
  0x52   : > { %600 = vsyncadd (%p871_p0), %s171_s6, 4294967168  ;;  %p872_p11 = scmp.eq.s32.totalorder %s674_s16, 0 }
  0x54   : > { %602 = dma.done.wait (%p872_p11), [#allocation6], 512   ;;  %p873_p1 = pmov %p872_p11 }
  0x55   : > { %v629_v0 = vmov 0.0|0.0   ;;  %vm630_vm0 = vmmov 0   ;;  %v631_v1 = vmov 0.0   ;;  %v202_v2 = vld [vmem:[#allocation5] sm:$0xff]  ;;  %v203_v3 = vld [vmem:[#allocation5 + $0x8] sm:$0xff]  ;;  %v204_v4 = vld [vmem:[#allocation5 + $0x10] sm:$0xff] }
  0x56   : > { %604 = vsyncadd (%p873_p1), [#allocation6], 4294966784  ;;  %425 = vmatprep.subr.bf16.mxu0 %v629_v0  ;;  %422 = vmatprep.mubr.msk.f32.mxu0 %vm630_vm0, %v631_v1  ;;  %v426_v5 = vpack.c.bf16 %v203_v3, %v202_v2  ;;  %v205_v6 = vld [vmem:[#allocation5 + $0x18] sm:$0xff]  ;;  %vm213_vm1 = vcmask 261120   ;;  %v403_v9 = vld [vmem:[%s858_s2] ss:$0 sm:$0xff] }
  0x57   : > { %v429_v7 = vpack.c.bf16 %v205_v6, %v204_v4  ;;  %v201_v8 = vld [vmem:[%s174_s7] sm:$0xff]  ;;  %s406_s4 = sshll.u32 %s674_s16, 7  ;;  %s200_s25 = scalar_lea.vmem [#allocation7], %s400_s22 }
  0x58   : > { %427 = vmatpush3.bf16.msra.mxu0 %v426_v5  ;;  %s313_s26 = sshll.u32 %s200_s25, 4  ;;  %s812_s9 = scalar_lea.hbm %s859_s3, %s406_s4  ;;  %s814_s26 = int_to_ptr.vmem [resolvable:$true] %s313_s26 }
  0x59   : > { %428 = vmatprep.subr.bf16.mxu0 %v629_v0  ;;  %s300_s10 = scalar_lea.sflag [#allocation4], %s789_s30  ;;  %s553_s11 = scalar_lea.vmem %s814_s26, 128 }
  0x5a   : > { %p554_p4 = scmp.ne.s32.totalorder %s814_s26, %s553_s11  ;;  %s632_s16 = smov [#allocation7]  }
  0x5b   : > { %s557_s27 = sshll.u32 %s632_s16, 4  ;;  %s558_s27 = int_to_ptr.vmem [resolvable:$false] %s557_s27 }
  0x5c   : > { %430 = vmatpush3.bf16.msra.mxu0 %v429_v7  ;;  %p555_p6 = pnand %p554_p4, %p744_p12  ;;  %s559_s28 = scalar_lea.vmem %s558_s27, 256 }
  0x5d   : > { %p560_p10 = scmp.lt.s32.totalorder %s814_s26, %s558_s27  ;;  %p561_p13 = scmp.lt.s32.totalorder %s559_s28, %s553_s11 }
  0x5e   : > { %p556_p8 = pneg %p555_p6 }
  0x5f   : > { %423 = vmatmul.mubr.msk.f32.vlgmr.msra.gmra.mrb[0].mxu0 %vm213_vm1, %v201_v8  ;;  %p562_p3 = por %p561_p13, %p560_p10 }
  0x61   : > { %p563_p7 = pnand %p562_p3, %p556_p8 }
 0x132   : > { %v283_v10 = vpop.f32.mrb[0].mxu0 }
 0x133   : > { %v284_v11 = vadd.f32 %v403_v9, %v283_v10  ;;  %v424_v12 = vpop.f32.mrb[1].mxu0 }
 0x135   : > { %287 = vadd.xlane.f32.xlu0 %v284_v11 }
 0x1c2   : > { %v288_v13 = vpop.xlane.xlu0 %287 }
 0x1c3   : > { %v289_v14 = vmul.f32 0.0078125, %v288_v13 }
 0x1c5   : > { %v290_v15 = vsub.f32 %v284_v11, %v289_v14 }
 0x1c7   : > { %v291_v16 = vmul.f32 %v290_v15, %v290_v15 }
 0x1c9   : > { %292 = vadd.xlane.f32.xlu0 %v291_v16 }
 0x256   : > { %v293_v17 = vpop.xlane.xlu0 %292 }
 0x257   : > { %v294_v18 = vmul.f32 0.0078125, %v293_v17 }
 0x259   : > { %v295_v19 = vadd.f32 1e-05, %v294_v18 }
 0x25b   : > { %493 = vrsqrt.f32 %v295_v19 }
 0x265   : > { %v494_v20 = vpop.eup %493 }
 0x266   : > { %v297_v21 = vmul.f32 %v494_v20, %v290_v15 }
 0x268   : > { %298 = vst [vmem:[%s200_s25] sm:$0xff] %v297_v21 }
 0x269   : > { %566 = shalt.err (!%p563_p7)
}
 0x26a   : > { %s567_s29 = scalar_lea.hbm %s812_s9, 128  ;;  %s571_s22 = scalar_lea.hbm %s859_s3, 256 }
 0x26b   : > { %p568_p9 = scmp.ne.s32.totalorder %s812_s9, %s567_s29  ;;  %p572_p0 = scmp.lt.u32.totalorder %s812_s9, %s859_s3 }
 0x26c   : > { %p573_p11 = scmp.lt.u32.totalorder %s571_s22, %s567_s29  ;;  %p575_p4 = scmp.lt.u32.totalorder %s567_s29, %s812_s9 }
 0x26d   : > { %p569_p2 = pnand %p568_p9, %p744_p12 }
 0x26e   : > { %p574_p1 = por %p573_p11, %p572_p0 }
 0x26f   : > { %p570_p5 = pneg %p569_p2 }
 0x270   : > { %p576_p6 = por %p575_p4, %p574_p1 }
 0x272   : > { %p577_p8 = pnand %p576_p6, %p570_p5 }
 0x274   : > { %580 = shalt.err (!%p577_p8)
}
 0x275   : > { %437 = dma.vmem_to_hbm [thread:$0]  (%p744_p12), %s814_s26, 128, %s812_s9, %s300_s10  }
 0x276 PF: > { %s325_s18 = sand.u32 1, %s611_s12   ;;  %p874_p10 = scmp.ne.s32.totalorder %s864_s19, 0 }
 0x277   : > { %p875_p13 = scmp.ge.s32.totalorder %s623_s15, 2  ;;  %s326_s20 = scalar_lea.sflag [#allocation4], %s325_s18 }
 0x279   : > { %p448_p3 = pnand %p875_p13, %p874_p10 }
 0x27b   : > { %606 = dma.done.wait (!%p448_p3), %s326_s20, 128  }
 0x27c   : > { %608 = vsyncadd (!%p448_p3), %s326_s20, 4294967168  ;;  %p17_p7 = scmp.ge.s32.totalorder %s709_s24, 4   ;;  %s876_s12 = smov %s615_s13 }
 0x27d   : > { %s877_s13 = smov %s619_s14  ;;  %s878_s14 = smov %s740_s17 }
 0x27e   : > { %s879_s15 = smov %s709_s24  ;;  %19 = sbr.rel (!%p17_p7) target bundleno = 6 (0x6), region = 81 }
 0x285   :  { %331 = vsyncpa [#allocation3], 1 }
 0x286   :  { %333 = vsyncpa [#allocation3 + $0x1], 1 }
 0x287   :  { %334 = vsyncpa [#allocation6], 1 }
 0x288   :  { %335 = vsyncpa [#allocation4], 1 }
 0x289   :  { %337 = vsyncpa [#allocation4 + $0x1], 1 }

</bundles_post_ra>
